<compile_context>
chip_gen: v7x
topology: tpu7x:2x2x1
jax: 0.10.0
libtpu: 0.0.40
codegen_flags: <defaults>
</compile_context>

<pallas_src>
import functools

import jax
import jax.numpy as jnp
from jax import lax
from jax.experimental import pallas as pl
from jax.experimental.pallas import tpu as pltpu
import numpy as np


# Vocab sizes up to this use the VMEM-resident table + count-matrix MXU path;
# larger vocabularies fall back to the HBM DMA-gather path.
_MXU_PATH_MAX_VOCAB = 4096


def _fm_epilogue(acc, bias, embed_dim):
    """Shared FM epilogue.

    acc : (TB, Dp) f32, row b = sum over fields of fused_table[x_{b,f}]
          fused columns: [0:D) factor sums s_d, D = sum_f w, D+1 = sum_f |v|^2.
    Returns (TB,) f32 = linear + 0.5 * (sum_d s_d^2 - sum_sq) + bias.
    """
    tb, dp = acc.shape
    lane = lax.broadcasted_iota(jnp.int32, (tb, dp), 1)
    linear = jnp.sum(jnp.where(lane == embed_dim, acc, 0.0), axis=-1)
    sum_sq = jnp.sum(jnp.where(lane == embed_dim + 1, acc, 0.0), axis=-1)
    s2 = jnp.sum(jnp.where(lane < embed_dim, acc * acc, 0.0), axis=-1)
    return linear + 0.5 * (s2 - sum_sq) + bias


def fm_mxu_kernel(idx_ref, table_ref, bias_ref, o_ref, *, embed_dim):
    """FM forward for one batch tile: VMEM-resident table + MXU count-matmul.

    idx_ref  : (1, TB, F) i32 VMEM -- per-tile indices (offsets already added)
    table_ref: (Vp, Dp)   f32 VMEM -- fused table, resident across grid steps
    bias_ref : (1, 1)     f32 SMEM -- global bias
    o_ref    : (1, TB)    f32 VMEM -- lane-dense output block
    """
    _, tb, num_fields = idx_ref.shape
    vp, _ = table_ref.shape
    idx = idx_ref[0]                                              # (TB, F)
    vocab_iota = lax.broadcasted_iota(jnp.int32, (tb, vp), 1)
    # Count matrix: counts[b, v] = #fields of row b that hit vocab entry v.
    counts = (idx[:, 0:1] == vocab_iota).astype(jnp.float32)      # (TB, Vp)
    for f in range(1, num_fields):
        counts = counts + (idx[:, f:f + 1] == vocab_iota).astype(jnp.float32)
    # One MXU matmul replaces the whole gather + field reduction.
    acc = jnp.dot(counts, table_ref[...],
                  preferred_element_type=jnp.float32)             # (TB, Dp)
    o_ref[0, :] = _fm_epilogue(acc, bias_ref[0, 0], embed_dim)


def fm_gather_kernel(idx_ref, table_ref, bias_ref, o_ref, gbuf, sem, *,
                     embed_dim):
    """FM forward for one batch tile: HBM table + per-row DMA gather (large V).

    idx_ref  : (1, F*TB)   i32 SMEM  -- field-major within tile: j = f*TB + b
    table_ref: (Vp, Dp)    f32 HBM (pl.ANY)
    bias_ref : (1, 1)      f32 SMEM
    o_ref    : (1, TB)     f32 VMEM
    gbuf     : (F, TB, Dp) f32 VMEM scratch
    sem      : (F,) DMA semaphores, one per field
    """
    num_fields, tb, dp = gbuf.shape

    # Issue every row-gather DMA for this tile up front.  The loop is unrolled
    # so scalar index loads and descriptor pushes pipeline back-to-back.
    for f in range(num_fields):
        def issue(b, carry, _f=f):
            row = idx_ref[0, _f * tb + b]
            pltpu.make_async_copy(
                table_ref.at[pl.ds(row, 1), :],
                gbuf.at[_f, pl.ds(b, 1), :],
                sem.at[_f],
            ).start()
            return carry
        lax.fori_loop(0, tb, issue, 0, unroll=8)

    # ONE wait per field (descriptor byte count == TB row copies on sem[f]),
    # accumulating field f while the DMAs of fields > f are still in flight.
    acc = None
    for f in range(num_fields):
        pltpu.make_async_copy(gbuf.at[f], gbuf.at[f], sem.at[f]).wait()
        acc = gbuf[f] if acc is None else acc + gbuf[f]

    o_ref[0, :] = _fm_epilogue(acc, bias_ref[0, 0], embed_dim)


def _build_fused_table(w, v):
    """Fused table: cols [0:D)=factors, D=w, D+1=sum_d v_d^2, rest zero pad."""
    vocab, d = v.shape
    dp = ((d + 2 + 127) // 128) * 128          # lane-pad fused row width
    vp = ((vocab + 7) // 8) * 8                # sublane-pad vocab
    vf = v.astype(jnp.float32)
    table = jnp.zeros((vp, dp), dtype=jnp.float32)
    table = table.at[:vocab, :d].set(vf)
    table = table.at[:vocab, d].set(w[:, 0].astype(jnp.float32))
    table = table.at[:vocab, d + 1].set(jnp.sum(vf * vf, axis=1))
    return table


def fm_forward(x_idx, w, v, bias, offsets, *, tile_b=512, force_path=None):
    """FM forward.  x_idx: (B, F) int; w: (V, 1); v: (V, D); bias: (1, 1)."""
    b, num_fields = x_idx.shape
    _, d = v.shape
    table = _build_fused_table(w, v)
    vp, dp = table.shape

    # TODO(synk): vocab < 2**31 assumed; PyTorch int64 indices cast to int32.
    idx = x_idx.astype(jnp.int32) + offsets[None, :].astype(jnp.int32)  # (B, F)

    # Big tiles amortize grid-step overhead; cap so there are >= 2 tiles when
    # B > 128 so both v7x TensorCores get work under the "parallel" grid.
    tile_b = max(128, min(tile_b, ((b + 1) // 2 + 127) // 128 * 128))
    num_tiles = (b + tile_b - 1) // tile_b
    bp = num_tiles * tile_b
    idx_pad = jnp.zeros((bp, num_fields), jnp.int32).at[:b, :].set(idx)

    if force_path is None:
        use_mxu = vp <= _MXU_PATH_MAX_VOCAB
    else:
        use_mxu = force_path == "mxu"

    compiler_params = pltpu.CompilerParams(
        dimension_semantics=("parallel",),      # tiles are self-contained
        vmem_limit_bytes=32 * 1024 * 1024,
    )

    if use_mxu:
        idx_tiles = idx_pad.reshape(num_tiles, tile_b, num_fields)
        out = pl.pallas_call(
            functools.partial(fm_mxu_kernel, embed_dim=d),
            out_shape=jax.ShapeDtypeStruct((1, bp), jnp.float32),
            grid=(num_tiles,),
            in_specs=[
                pl.BlockSpec((1, tile_b, num_fields), lambda i: (i, 0, 0)),
                pl.BlockSpec((vp, dp), lambda i: (0, 0)),   # resident in VMEM
                pl.BlockSpec(memory_space=pltpu.MemorySpace.SMEM),
            ],
            out_specs=pl.BlockSpec((1, tile_b), lambda i: (0, i)),
            compiler_params=compiler_params,
        )(idx_tiles, table, bias)
    else:
        # Field-major flattening within each tile: flat index j = f*tile_b + b.
        idx_tiles = (idx_pad.reshape(num_tiles, tile_b, num_fields)
                     .transpose(0, 2, 1)
                     .reshape(num_tiles, num_fields * tile_b))
        # TODO(synk): padded rows of the last tile still gather table row 0;
        # clamping the issue loop to the valid row count would save those DMAs.
        out = pl.pallas_call(
            functools.partial(fm_gather_kernel, embed_dim=d),
            out_shape=jax.ShapeDtypeStruct((1, bp), jnp.float32),
            grid=(num_tiles,),
            in_specs=[
                pl.BlockSpec((1, num_fields * tile_b), lambda i: (i, 0),
                             memory_space=pltpu.MemorySpace.SMEM),
                pl.BlockSpec(memory_space=pl.ANY),           # table stays in HBM
                pl.BlockSpec(memory_space=pltpu.MemorySpace.SMEM),
            ],
            out_specs=pl.BlockSpec((1, tile_b), lambda i: (0, i)),
            scratch_shapes=[
                pltpu.VMEM((num_fields, tile_b, dp), jnp.float32),
                pltpu.SemaphoreType.DMA((num_fields,)),
            ],
            compiler_params=compiler_params,
        )(idx_tiles, table, bias)

    return out[0, :b].reshape(b, 1)


def fm_reference(x_idx, w, v, bias, offsets):
    """Pure-JAX reference for correctness checking."""
    idx = x_idx + offsets[None, :]
    lw = w[idx, 0]                                   # (B, F)
    emb = v[idx]                                     # (B, F, D)
    linear = jnp.sum(lw, axis=1, keepdims=True) + bias[0, 0]
    s = jnp.sum(emb, axis=1)
    sq = jnp.sum(emb ** 2, axis=1)
    inter = 0.5 * jnp.sum(s ** 2 - sq, axis=1, keepdims=True)
    return linear + inter


if __name__ == "__main__":
    field_dims = (8, 16, 24)          # per-field vocabulary sizes
    embed_dim = 16
    batch = 200                       # exercises batch padding + a 2-tile grid
    vocab = int(np.sum(field_dims))
    offsets = jnp.asarray(np.concatenate(([0], np.cumsum(field_dims)[:-1])),
                          dtype=jnp.int32)

    key = jax.random.PRNGKey(0)
    k_x, k_w, k_v = jax.random.split(key, 3)

    w = jax.random.normal(k_w, (vocab, 1), dtype=jnp.float32) * 0.01
    v = jax.random.normal(k_v, (vocab, embed_dim), dtype=jnp.float32) * 0.01
    bias = jnp.zeros((1, 1), dtype=jnp.float32)

    x_cols = [
        jax.random.randint(jax.random.fold_in(k_x, f), (batch, 1), 0, dsz)
        for f, dsz in enumerate(field_dims)
    ]
    x_idx = jnp.concatenate(x_cols, axis=1).astype(jnp.int32)   # (B, F)

    ref = np.asarray(fm_reference(x_idx, w, v, bias, offsets))

    # Primary path: VMEM-resident table + count-matrix MXU gather.  Tolerance
    # leaves headroom for MXU bf16-pass rounding of the f32 count matmul.
    out_mxu = jax.block_until_ready(
        fm_forward(x_idx, w, v, bias, offsets, force_path="mxu"))
    if not np.allclose(np.asarray(out_mxu), ref, rtol=1e-3, atol=1e-3):
        raise AssertionError("MXU-path FM kernel does not match JAX reference")

    # Large-vocab fallback path: HBM table + per-row DMA gather (pure f32 adds,
    # so it must match the reference tightly).
    out_dma = jax.block_until_ready(
        fm_forward(x_idx, w, v, bias, offsets, force_path="gather"))
    if not np.allclose(np.asarray(out_dma), ref, rtol=1e-5, atol=1e-5):
        raise AssertionError("Gather-path FM kernel does not match JAX reference")

    print("KERNEL_OK")
</pallas_src>

<mosaic_0001>
module attributes {stable_mosaic.version = 11 : i64} {
  func.func @fm_mxu_kernel(%arg0: i32, %arg1: memref<1x128x3xi32, #tpu.memory_space<vmem>>, %arg2: memref<48x128xf32, #tpu.memory_space<vmem>>, %arg3: memref<1x1xf32, #tpu.memory_space<smem>>, %arg4: memref<1x128xf32, #tpu.memory_space<vmem>>) attributes {dimension_semantics = [#tpu.dimension_semantics<parallel>], iteration_bounds = array<i64: 2>, scalar_prefetch = 0 : i64, scratch_operands = 0 : i64, tpu.core_type = #tpu.core_type<tc>, window_params = [{transform_indices = @transform_0, window_bounds = array<i64: 1, 128, 3>}, {pipeline_mode = #tpu.pipeline_mode<synchronous>, transform_indices = @transform_1, window_bounds = array<i64: 48, 128>}, {transform_indices = @transform_2, window_bounds = array<i64: 1, 1>}, {transform_indices = @transform_3, window_bounds = array<i64: 1, 128>}]} {
    %c0 = arith.constant 0 : index
    %c0_0 = arith.constant 0 : index
    %c0_1 = arith.constant 0 : index
    %0 = vector.load %arg1[%c0, %c0_0, %c0_1] : memref<1x128x3xi32, #tpu.memory_space<vmem>>, vector<1x128x3xi32>
    %1 = vector.shape_cast %0 : vector<1x128x3xi32> to vector<128x3xi32>
    %2 = tpu.iota {dimensions = array<i32: 1>} : vector<128x48xi32>
    %3 = vector.extract_strided_slice %1 {offsets = [0, 0], sizes = [128, 1], strides = [1, 1]} : vector<128x3xi32> to vector<128x1xi32>
    %4 = vector.broadcast %3 : vector<128x1xi32> to vector<128x48xi32>
    %5 = arith.cmpi eq, %4, %2 : vector<128x48xi32>
    %6 = arith.extui %5 : vector<128x48xi1> to vector<128x48xi32>
    %7 = arith.sitofp %6 : vector<128x48xi32> to vector<128x48xf32>
    %8 = vector.extract_strided_slice %1 {offsets = [0, 1], sizes = [128, 1], strides = [1, 1]} : vector<128x3xi32> to vector<128x1xi32>
    %9 = vector.broadcast %8 : vector<128x1xi32> to vector<128x48xi32>
    %10 = arith.cmpi eq, %9, %2 : vector<128x48xi32>
    %11 = arith.extui %10 : vector<128x48xi1> to vector<128x48xi32>
    %12 = arith.sitofp %11 : vector<128x48xi32> to vector<128x48xf32>
    %13 = arith.addf %7, %12 : vector<128x48xf32>
    %14 = vector.extract_strided_slice %1 {offsets = [0, 2], sizes = [128, 1], strides = [1, 1]} : vector<128x3xi32> to vector<128x1xi32>
    %15 = vector.broadcast %14 : vector<128x1xi32> to vector<128x48xi32>
    %16 = arith.cmpi eq, %15, %2 : vector<128x48xi32>
    %17 = arith.extui %16 : vector<128x48xi1> to vector<128x48xi32>
    %18 = arith.sitofp %17 : vector<128x48xi32> to vector<128x48xf32>
    %19 = arith.addf %13, %18 : vector<128x48xf32>
    %c0_2 = arith.constant 0 : index
    %c0_3 = arith.constant 0 : index
    %20 = vector.load %arg2[%c0_2, %c0_3] : memref<48x128xf32, #tpu.memory_space<vmem>>, vector<48x128xf32>
    %cst = arith.constant dense<0.000000e+00> : vector<128x128xf32>
    %21 = tpu.matmul %19, %20, %cst {dimension_numbers = #tpu.dot_dimension_numbers<[1], [0], [0], [1], [0, 0, 1, 1], [], []>} : vector<128x48xf32>, vector<48x128xf32>, vector<128x128xf32> -> vector<128x128xf32>
    %c0_4 = arith.constant 0 : index
    %c0_5 = arith.constant 0 : index
    %22 = memref.load %arg3[%c0_4, %c0_5] : memref<1x1xf32, #tpu.memory_space<smem>>
    %23 = tpu.iota {dimensions = array<i32: 1>} : vector<128x128xi32>
    %c16_i32 = arith.constant 16 : i32
    %24 = vector.broadcast %c16_i32 : i32 to vector<128x128xi32>
    %25 = arith.cmpi eq, %23, %24 : vector<128x128xi32>
    %cst_6 = arith.constant 0.000000e+00 : f32
    %26 = vector.broadcast %cst_6 : f32 to vector<128x128xf32>
    %27 = arith.select %25, %21, %26 : vector<128x128xi1>, vector<128x128xf32>
    %cst_7 = arith.constant dense<0.000000e+00> : vector<128xf32>
    %28 = vector.multi_reduction <add>, %27, %cst_7 [1] : vector<128x128xf32> to vector<128xf32>
    %c17_i32 = arith.constant 17 : i32
    %29 = vector.broadcast %c17_i32 : i32 to vector<128x128xi32>
    %30 = arith.cmpi eq, %23, %29 : vector<128x128xi32>
    %cst_8 = arith.constant 0.000000e+00 : f32
    %31 = vector.broadcast %cst_8 : f32 to vector<128x128xf32>
    %32 = arith.select %30, %21, %31 : vector<128x128xi1>, vector<128x128xf32>
    %cst_9 = arith.constant dense<0.000000e+00> : vector<128xf32>
    %33 = vector.multi_reduction <add>, %32, %cst_9 [1] : vector<128x128xf32> to vector<128xf32>
    %c16_i32_10 = arith.constant 16 : i32
    %34 = vector.broadcast %c16_i32_10 : i32 to vector<128x128xi32>
    %35 = arith.cmpi slt, %23, %34 : vector<128x128xi32>
    %36 = arith.mulf %21, %21 : vector<128x128xf32>
    %cst_11 = arith.constant 0.000000e+00 : f32
    %37 = vector.broadcast %cst_11 : f32 to vector<128x128xf32>
    %38 = arith.select %35, %36, %37 : vector<128x128xi1>, vector<128x128xf32>
    %cst_12 = arith.constant dense<0.000000e+00> : vector<128xf32>
    %39 = vector.multi_reduction <add>, %38, %cst_12 [1] : vector<128x128xf32> to vector<128xf32>
    %40 = arith.subf %39, %33 : vector<128xf32>
    %cst_13 = arith.constant 5.000000e-01 : f32
    %41 = vector.broadcast %cst_13 : f32 to vector<128xf32>
    %42 = arith.mulf %41, %40 : vector<128xf32>
    %43 = arith.addf %28, %42 : vector<128xf32>
    %44 = vector.broadcast %22 : f32 to vector<128xf32>
    %45 = arith.addf %43, %44 : vector<128xf32>
    %c0_14 = arith.constant 0 : index
    %c0_15 = arith.constant 0 : index
    %46 = vector.load %arg4[%c0_14, %c0_15] : memref<1x128xf32, #tpu.memory_space<vmem>>, vector<1x128xf32>
    %47 = vector.shape_cast %46 : vector<1x128xf32> to vector<128xf32>
    %48 = vector.shape_cast %45 : vector<128xf32> to vector<1x128xf32>
    tpu.vector_store %arg4[%c0_14, %c0_15], %48 {strides = array<i32>} : memref<1x128xf32, #tpu.memory_space<vmem>>, vector<1x128xf32>,
    return
  }
  func.func @transform_0(%arg0: i32) -> (i32, i32, i32) {
    %c0_i32 = arith.constant 0 : i32
    %c0_i32_0 = arith.constant 0 : i32
    %c0_i32_1 = arith.constant 0 : i32
    return %arg0, %c0_i32, %c0_i32_0 : i32, i32, i32
  }
  func.func @transform_1(%arg0: i32) -> (i32, i32) {
    %c0_i32 = arith.constant 0 : i32
    %c0_i32_0 = arith.constant 0 : i32
    %c0_i32_1 = arith.constant 0 : i32
    return %c0_i32, %c0_i32_0 : i32, i32
  }
  func.func @transform_2(%arg0: i32) -> (i32, i32) {
    %c0_i32 = arith.constant 0 : i32
    %c0_i32_0 = arith.constant 0 : i32
    %c0_i32_1 = arith.constant 0 : i32
    return %c0_i32, %c0_i32_0 : i32, i32
  }
  func.func @transform_3(%arg0: i32) -> (i32, i32) {
    %c0_i32 = arith.constant 0 : i32
    %c0_i32_0 = arith.constant 0 : i32
    return %c0_i32, %arg0 : i32, i32
  }
}

</mosaic_0001>

<bundles_post_ra>
// kernel: tpu_custom_call.1
= control target key start
LH: loop header
LB: loop body
LE: loop exit
PB: predicated region body
PF: predicated region fallthrough
CT: control target
= control target key end

     0   :  { %s2024_s0 = inlined_call_operand.vmem [shape: s32[2,128,3], index: 0, kind: input, shape index: {}]   ;;  %s2025_s1 = inlined_call_operand.vmem [shape: f32[48,128], index: 1, kind: input, shape index: {}]   ;;  %s2026_s2 = inlined_call_operand.<no memory space> [shape: f32[1,1], index: 2, kind: input, shape index: {}]   ;;  %s2027_s3 = inlined_call_operand.hbm [shape: f32[1,256], index: 3, kind: output, shape index: {}]  }
   0x1   :  { %8 = sst [smem:[#allocation2]] %s2026_s2 }
   0x2   :  { %9 = vsyncpa [#allocation4], 0 }
   0x3   :  { %11 = vsyncpa [#allocation4 + $0x1], 0  ;;  %s1443_s14 = smov 0   ;;  %s1445_s15 = smov 0  }
   0x4   :  { %s1447_s16 = smov 0   ;;  %s1449_s17 = smov 0  }
   0x5 LB: > { %s1464_s2 = sadd.s32 4294967295, %s1413_s17   ;;  %s1131_s18 = sadd.s32 4294967294, %s1413_s17   ;;  %s1413_s17 = sphi %s1449_s17, %s2033_s17   ;;  %s1409_s16 = sphi %s1447_s16, %s2032_s16   ;;  %s1405_s15 = sphi %s1445_s15, %s2031_s15   ;;  %s1401_s14 = sphi %s1443_s14, %s2030_s14  }
   0x6   : > { %s1468_s19 = sadd.s32 1, %s1413_s17   ;;  %s92_s20 = sadd.s32 1, %s1409_s16 }
   0x7   : > { %s89_s21 = ssub.s32 %s1413_s17, %s1468_s19  ;;  %p102_p0 = scmp.ne.s32.totalorder %s1409_s16, %s1405_s15 }
   0x8   : > { %p90_p1 = scmp.eq.s32.totalorder %s89_s21, 0  ;;  %p103_p2 = scmp.eq.s32.totalorder %s1464_s2, 1 }
   0x9   : > { %p108_p3 = scmp.ne.s32.totalorder %s1405_s15, %s1401_s14  ;;  %p109_p4 = scmp.eq.s32.totalorder %s1131_s18, 1 }
   0xa   : > { %s1479_s22 = scalar_select %p90_p1, %s1409_s16, %s92_s20  }
   0xb   : > { %p1481_p5 = por %p103_p2, %p102_p0  ;;  %p1485_p6 = por %p109_p4, %p108_p3 }
   0xc   : > { %p1134_p7 = scmp.ge.s32.totalorder %s1413_s17, 1  ;;  %p141_p8 = scmp.lt.s32.totalorder %s1413_s17, 3 }
   0xe   : > { %p142_p9 = pnand %p1134_p7, %p141_p8 }
   0xf   : > { %p164_p10 = scmp.lt.s32.totalorder (!%p142_p9), %s1464_s2, 1  ;;  %v1415_v0 = vmov (!%p142_p9), 1   ;;  %v1416_v1 = vmov (!%p142_p9), 0   ;;  %v1417_v5 = vmov (!%p142_p9), 2   ;;  %v507_v10 = vld [vmem:[%s2025_s1] sm:$0xff] (!%p142_p9)  ;;  %v508_v11 = vld [vmem:[%s2025_s1 + $0x8] sm:$0xff] (!%p142_p9)  ;;  %v185_v37 = vlaneseq (!%p142_p9) }
  0x10   : > { %145 = sbr.rel (%p142_p9) target bundleno = 708 (0x2c4), region = 32  ;;  %1324 = vset.pattern.permute.xlu0 (!%p142_p9), %v1415_v0  ;;  %1325 = vset.pattern.permute.xlu1 (!%p142_p9), %v1416_v1  ;;  %v1263_v12 = vpack.c.bf16 (!%p142_p9), %v508_v11, %v507_v10  ;;  %v509_v13 = vld [vmem:[%s2025_s1 + $0x10] sm:$0xff] (!%p142_p9)  ;;  %v510_v14 = vld [vmem:[%s2025_s1 + $0x18] sm:$0xff] (!%p142_p9)  ;;  %v511_v16 = vld [vmem:[%s2025_s1 + $0x20] sm:$0xff] (!%p142_p9)  ;;  %v1418_v43 = vmov (!%p142_p9), 0.0   ;;  %vm513_vm10 = vcmask (!%p142_p9), 392192  }
  0x11   : > { %v1267_v15 = vpack.c.bf16 (!%p142_p9), %v510_v14, %v509_v13  ;;  %v512_v17 = vld [vmem:[%s2025_s1 + $0x28] sm:$0xff] (!%p142_p9)  ;;  %v1567_v40 = vand.u32 (!%p142_p9), 127, %v185_v37  ;;  %s707_s20 = sld [smem:[#allocation2]] (!%p142_p9)  ;;  %s162_s21 = sand.u32 (!%p142_p9), 1, %s1405_s15  }
  0x12   : > { %1264 = vmatprep.subr.bf16.mxu0 (!%p142_p9), %v1263_v12  ;;  %1275 = vmatprep.subr.bf16.mxu1 (!%p142_p9), %v1263_v12  ;;  %v1271_v18 = vpack.c.bf16 (!%p142_p9), %v512_v17, %v511_v16  ;;  %s1419_s5 = smov (!%p142_p9), [#allocation3]  }
  0x13   : > { %1266 = vmatpush3.bf16.msra.mxu0 (!%p142_p9), %v1263_v12  ;;  %1278 = vmatpush3.bf16.msra.mxu1 (!%p142_p9), %v1263_v12  ;;  %s1355_s6 = sshll.u32 (!%p142_p9), %s1419_s5, 4  ;;  %s1356_s6 = int_to_ptr.vmem [resolvable:$false] %s1355_s6 }
  0x14   : > { %1268 = vmatprep.subr.bf16.mxu0 (!%p142_p9), %v1267_v15  ;;  %1276 = vmatprep.subr.bf16.mxu1 (!%p142_p9), %v1267_v15  ;;  %s1357_s7 = scalar_lea.vmem (!%p142_p9), %s1356_s6, 32 }
  0x17   : > { %s165_s25 = scalar_select %p164_p10, %s1464_s2, 1  ;;  %1270 = vmatpush3.bf16.msra.mxu0 %v1267_v15  ;;  %1279 = vmatpush3.bf16.msra.mxu1 %v1267_v15 }
  0x18   : > { %1272 = vmatprep.subr.bf16.mxu0 %v1271_v18  ;;  %1277 = vmatprep.subr.bf16.mxu1 %v1271_v18 }
  0x19   : > { %s1204_s26 = sshll.u32 %s165_s25, 7  ;;  %s1201_s25 = sshll.u32 %s1464_s2, 4 }
  0x1a   : > { %s1498_s29 = scalar_lea.vmem %s2024_s0, %s1204_s26  ;;  %s163_s26 = scalar_lea.vmem [#allocation3], %s162_s21 }
  0x1b   : > { %v170_v2 = vld [vmem:[%s1498_s29 + $0x8] sm:$0xff]  ;;  %v169_v3 = vld [vmem:[%s1498_s29] sm:$0xff]  ;;  %v172_v6 = vld [vmem:[%s1498_s29 + $0x18] sm:$0xff]  ;;  %1274 = vmatpush3.bf16.msra.mxu0 %v1271_v18  ;;  %1280 = vmatpush3.bf16.msra.mxu1 %v1271_v18  ;;  %s1076_s27 = sshll.u32 %s163_s26, 4  ;;  %s1980_s30 = scalar_lea.hbm %s2027_s3, %s1201_s25  ;;  %s1982_s27 = int_to_ptr.vmem [resolvable:$true] %s1076_s27 }
  0x1c   : > { %191 = vperm.xlu1 %1325, %v170_v2   ;;  %284 = vperm.xlu0 %1324, %v169_v3   ;;  %v173_v4 = vld [vmem:[%s1498_s29 + $0x20] sm:$0xff]  ;;  %v171_v7 = vld [vmem:[%s1498_s29 + $0x10] sm:$0xff]  ;;  %v178_v8 = vld [vmem:[%s1498_s29 + $0x48] sm:$0xff]  ;;  %s1064_s2 = scalar_lea.sflag [#allocation4], %s162_s21  ;;  %s1351_s4 = scalar_lea.vmem %s1982_s27, 16 }
  0x1d   : > { %v1512_v9 = vld [vmem:[%s1498_s29 + $0x50] sm:$0xff]  ;;  %v177_v19 = vld [vmem:[%s1498_s29 + $0x40] sm:$0xff]  ;;  %v176_v20 = vld [vmem:[%s1498_s29 + $0x38] sm:$0xff]  ;;  %p1352_p11 = scmp.ne.s32.totalorder %s1982_s27, %s1351_s4  ;;  %p1358_p0 = scmp.lt.s32.totalorder %s1982_s27, %s1356_s6 }
  0x1e   : > { %v174_v21 = vld [vmem:[%s1498_s29 + $0x28] sm:$0xff]  ;;  %v181_v22 = vld [vmem:[%s1498_s29 + $0x60] sm:$0xff]  ;;  %v183_v23 = vld [vmem:[%s1498_s29 + $0x70] sm:$0xff]  ;;  %p1359_p1 = scmp.lt.s32.totalorder %s1357_s7, %s1351_s4 }
  0x1f   : > { %v182_v24 = vld [vmem:[%s1498_s29 + $0x68] sm:$0xff]  ;;  %v184_v25 = vld [vmem:[%s1498_s29 + $0x78] sm:$0xff]  ;;  %v175_v26 = vld [vmem:[%s1498_s29 + $0x30] sm:$0xff]  ;;  %p1353_p12 = pnand %p1352_p11, %p1481_p5 }
  0x20   : > { %1326 = vset.pattern.permute.xlu1 %v1415_v0  ;;  %296 = vperm.xlu0 %1324, %v173_v4   ;;  %v180_v27 = vld [vmem:[%s1498_s29 + $0x58] sm:$0xff]  ;;  %p1360_p2 = por %p1359_p1, %p1358_p0 }
  0x21   : > { %287 = vperm.xlu1 %1326, %v170_v2   ;;  %p1354_p13 = pneg %p1353_p12 }
  0x23   : > { %p1361_p3 = pnand %p1360_p2, %p1354_p13 }
  0x24   : > { %1332 = vset.pattern.permute.xlu0 %v1417_v5 }
  0x25   : > { %1327 = vset.pattern.permute.xlu1 %v1417_v5  ;;  %399 = vperm.xlu0 %1332, %v170_v2  }
  0x26   : > { %396 = vperm.xlu1 %1327, %v169_v3  }
  0x29   : > { %405 = vperm.xlu0 %1332, %v172_v6  }
  0x2a   : > { %1328 = vset.pattern.permute.xlu1 %v1416_v1 }
  0x2b   : > { %194 = vperm.xlu1 %1328, %v171_v7  }
  0x2d   : > { %408 = vperm.xlu0 %1332, %v173_v4  }
  0x2f   : > { %1329 = vset.pattern.permute.xlu1 %v1415_v0 }
  0x30   : > { %290 = vperm.xlu1 %1329, %v171_v7  }
  0x31   : > { %423 = vperm.xlu0 %1332, %v178_v8  }
  0x34   : > { %293 = vperm.xlu1 %1329, %v172_v6  }
  0x35   : > { %426 = vperm.xlu0 %1332, %v1512_v9  }
  0x38   : > { %1330 = vset.pattern.permute.xlu1 %v1417_v5 }
  0x39   : > { %402 = vperm.xlu1 %1330, %v171_v7   ;;  %1342 = vset.pattern.permute.xlu0 %v1416_v1 }
  0x3a   : > { %188 = vperm.xlu0 %1342, %v169_v3  }
  0x3d   : > { %1331 = vset.pattern.permute.xlu1 %v1416_v1 }
  0x3e   : > { %200 = vperm.xlu1 %1331, %v173_v4   ;;  %197 = vperm.xlu0 %1342, %v172_v6  }
  0x42   : > { %212 = vperm.xlu1 %1331, %v177_v19   ;;  %215 = vperm.xlu0 %1342, %v178_v8  }
  0x46   : > { %1333 = vset.pattern.permute.xlu1 %v1415_v0  ;;  %218 = vperm.xlu0 %1342, %v1512_v9  }
  0x47   : > { %308 = vperm.xlu1 %1333, %v177_v19  }
  0x4a   : > { %209 = vperm.xlu0 %1342, %v176_v20  }
  0x4b   : > { %1334 = vset.pattern.permute.xlu1 %v1416_v1 }
  0x4c   : > { %203 = vperm.xlu1 %1334, %v174_v21  }
  0x4e   : > { %224 = vperm.xlu0 %1342, %v181_v22  }
  0x50   : > { %1335 = vset.pattern.permute.xlu1 %v1415_v0 }
  0x51   : > { %299 = vperm.xlu1 %1335, %v174_v21  }
  0x52   : > { %230 = vperm.xlu0 %1342, %v183_v23  }
  0x55   : > { %311 = vperm.xlu1 %1335, %v178_v8  }
  0x56   : > { %1346 = vset.pattern.permute.xlu0 %v1415_v0 }
  0x57   : > { %305 = vperm.xlu0 %1346, %v176_v20  }
  0x59   : > { %1336 = vset.pattern.permute.xlu1 %v1417_v5 }
  0x5a   : > { %420 = vperm.xlu1 %1336, %v177_v19  }
  0x5b   : > { %323 = vperm.xlu0 %1346, %v182_v24  }
  0x5e   : > { %411 = vperm.xlu1 %1336, %v174_v21  }
  0x5f   : > { %329 = vperm.xlu0 %1346, %v184_v25  }
  0x62   : > { %1337 = vset.pattern.permute.xlu1 %v1416_v1 }
  0x63   : > { %206 = vperm.xlu1 %1337, %v175_v26   ;;  %1350 = vset.pattern.permute.xlu0 %v1417_v5 }
  0x67   : > { %1338 = vset.pattern.permute.xlu1 %v1415_v0 }
  0x68   : > { %302 = vperm.xlu1 %1338, %v175_v26  }
  0x6c   : > { %314 = vperm.xlu1 %1338, %v1512_v9  }
  0x70   : > { %1339 = vset.pattern.permute.xlu1 %v1416_v1 }
  0x71   : > { %221 = vperm.xlu1 %1339, %v180_v27  }
  0x75   : > { %1340 = vset.pattern.permute.xlu1 %v1415_v0 }
  0x76   : > { %317 = vperm.xlu1 %1340, %v180_v27  }
  0x7a   : > { %1341 = vset.pattern.permute.xlu1 %v1417_v5 }
  0x7b   : > { %414 = vperm.xlu1 %1341, %v175_v26  }
  0x7f   : > { %417 = vperm.xlu1 %1341, %v176_v20  }
  0x83   : > { %429 = vperm.xlu1 %1341, %v180_v27  }
  0x87   : > { %1343 = vset.pattern.permute.xlu1 %v1415_v0 }
  0x88   : > { %320 = vperm.xlu1 %1343, %v181_v22  }
  0x8c   : > { %1344 = vset.pattern.permute.xlu1 %v1416_v1 }
  0x8d   : > { %227 = vperm.xlu1 %1344, %v182_v24  }
  0x91   : > { %1345 = vset.pattern.permute.xlu1 %v1417_v5 }
  0x92   : > { %432 = vperm.xlu1 %1345, %v181_v22  }
  0x96   : > { %435 = vperm.xlu1 %1345, %v182_v24  }
  0x9a   : > { %1347 = vset.pattern.permute.xlu1 %v1415_v0 }
  0x9b   : > { %v192_v28 = vpop.permute.xlu1 %191  ;;  %326 = vperm.xlu1 %1347, %v183_v23   ;;  %v285_v29 = vpop.permute.xlu0 %284 }
  0x9c   : > { %vm236_vm1 = vcmp.eq.s32.totalorder %v192_v28, %v1567_v40  ;;  %vm331_vm2 = vcmp.eq.s32.totalorder %v285_v29, %v1567_v40 }
  0x9d   : > { %v1138_v45 = vsel %vm236_vm1, 1.0, %v1418_v43  ;;  %v1153_v47 = vsel %vm331_vm2, 1.0, %v1418_v43 }
  0x9f   : > { %1348 = vset.pattern.permute.xlu1 %v1416_v1  ;;  %v297_v30 = vpop.permute.xlu0 %296 }
  0xa0   : > { %v288_v31 = vpop.permute.xlu1 %287  ;;  %233 = vperm.xlu1 %1348, %v184_v25   ;;  %vm335_vm4 = vcmp.eq.s32.totalorder %v297_v30, %v1567_v40 }
  0xa1   : > { %vm332_vm0 = vcmp.eq.s32.totalorder %v288_v31, %v1567_v40  ;;  %v1157_v51 = vsel %vm335_vm4, 1.0, %v1418_v43 }
  0xa2   : > { %v1154_v44 = vsel %vm332_vm0, 1.0, %v1418_v43 }
  0xa3   : > { %v380_v48 = vadd.f32 %v1154_v44, %v1138_v45 }
  0xa4   : > { %1349 = vset.pattern.permute.xlu1 %v1417_v5  ;;  %v400_v32 = vpop.permute.xlu0 %399 }
  0xa5   : > { %438 = vperm.xlu1 %1349, %v183_v23   ;;  %v397_v33 = vpop.permute.xlu1 %396  ;;  %vm444_vm3 = vcmp.eq.s32.totalorder %v400_v32, %v1567_v40 }
  0xa6   : > { %v1170_v49 = vsel %vm444_vm3, 1.0, %v1418_v43  ;;  %vm443_vm6 = vcmp.eq.s32.totalorder %v397_v33, %v1567_v40 }
  0xa7   : > { %v492_v54 = vadd.f32 %v1170_v49, %v380_v48  ;;  %v1169_v60 = vsel %vm443_vm6, 1.0, %v1418_v43 }
  0xa8   : > { %v406_v34 = vpop.permute.xlu0 %405 }
  0xa9   : > { %441 = vperm.xlu1 %1349, %v184_v25   ;;  %vm446_vm11 = vcmp.eq.s32.totalorder %v406_v34, %v1567_v40 }
  0xaa   : > { %v195_v35 = vpop.permute.xlu1 %194  ;;  %v1172_v63 = vsel %vm446_vm11, 1.0, %v1418_v43 }
  0xab   : > { %vm237_vm7 = vcmp.eq.s32.totalorder %v195_v35, %v1567_v40 }
  0xac   : > { %v409_v36 = vpop.permute.xlu0 %408  ;;  %v1139_v56 = vsel %vm237_vm7, 1.0, %v1418_v43 }
  0xad   : > { %vm447_vm13 = vcmp.eq.s32.totalorder %v409_v36, %v1567_v40 }
  0xae   : > { %v1173_v6 = vsel %vm447_vm13, 1.0, %v1418_v43 }
  0xaf   : > { %v291_v38 = vpop.permute.xlu1 %290 }
  0xb0   : > { %v1564_v39 = vpop.permute.xlu0 %423  ;;  %vm333_vm5 = vcmp.eq.s32.totalorder %v291_v38, %v1567_v40 }
  0xb1   : > { %v1155_v52 = vsel %vm333_vm5, 1.0, %v1418_v43  ;;  %vm452_vm5 = vcmp.eq.s32.totalorder %v1564_v39, %v1567_v40 }
  0xb2   : > { %v381_v61 = vadd.f32 %v1155_v52, %v1139_v56  ;;  %v1178_v24 = vsel %vm452_vm5, 1.0, %v1418_v43 }
  0xb3   : > { %v294_v41 = vpop.permute.xlu1 %293 }
  0xb4   : > { %v1570_v42 = vpop.permute.xlu0 %426  ;;  %vm334_vm12 = vcmp.eq.s32.totalorder %v294_v41, %v1567_v40 }
  0xb5   : > { %v1156_v0 = vsel %vm334_vm12, 1.0, %v1418_v43  ;;  %vm453_vm11 = vcmp.eq.s32.totalorder %v1570_v42, %v1567_v40 }
  0xb6   : > { %v1179_v45 = vsel %vm453_vm11, 1.0, %v1418_v43 }
  0xb8   : > { %v403_v46 = vpop.permute.xlu1 %402 }
  0xb9   : > { %v189_v50 = vpop.permute.xlu0 %188  ;;  %vm445_vm8 = vcmp.eq.s32.totalorder %v403_v46, %v1567_v40 }
  0xba   : > { %vm235_vm9 = vcmp.eq.s32.totalorder %v189_v50, %v1567_v40  ;;  %v1171_v57 = vsel %vm445_vm8, 1.0, %v1418_v43 }
  0xbb   : > { %v1137_v53 = vsel %vm235_vm9, 1.0, %v1418_v43  ;;  %v493_v3 = vadd.f32 %v1171_v57, %v381_v61 }
  0xbc   : > { %v379_v55 = vadd.f32 %v1153_v47, %v1137_v53 }
  0xbd   : > { %v201_v58 = vpop.permute.xlu1 %200  ;;  %v198_v59 = vpop.permute.xlu0 %197 }
  0xbe   : > { %vm239_vm14 = vcmp.eq.s32.totalorder %v201_v58, %v1567_v40  ;;  %vm238_vm15 = vcmp.eq.s32.totalorder %v198_v59, %v1567_v40  ;;  %v491_v62 = vadd.f32 %v1169_v60, %v379_v55 }
  0xbf   : > { %v1141_v1 = vsel %vm239_vm14, 1.0, %v1418_v43  ;;  %v1140_v2 = vsel %vm238_vm15, 1.0, %v1418_v43 }
  0xc0   : > { %v383_v4 = vadd.f32 %v1157_v51, %v1141_v1  ;;  %v382_v5 = vadd.f32 %v1156_v0, %v1140_v2  ;;  %1239 = vmatprep.mubr.msk.f32.mxu0 %vm513_vm10, %v491_v62 }
  0xc1   : > { %v213_v7 = vpop.permute.xlu1 %212  ;;  %1240 = vmatmul.mubr.msk.f32.vlgmr.msra.gmra.mrb[0].mxu0 %vm513_vm10, %v492_v54  ;;  %v216_v13 = vpop.permute.xlu0 %215 }
  0xc2   : > { %v494_v8 = vadd.f32 %v1172_v63, %v382_v5  ;;  %1242 = vmatprep.mubr.msk.f32.mxu0 %vm513_vm10, %v493_v3  ;;  %v495_v9 = vadd.f32 %v1173_v6, %v383_v4  ;;  %vm244_vm0 = vcmp.eq.s32.totalorder %v216_v13, %v1567_v40  ;;  %vm243_vm3 = vcmp.eq.s32.totalorder %v213_v7, %v1567_v40 }
  0xc3   : > { %v1146_v15 = vsel %vm244_vm0, 1.0, %v1418_v43  ;;  %v1145_v18 = vsel %vm243_vm3, 1.0, %v1418_v43 }
  0xc5   : > { %1243 = vmatmul.mubr.msk.f32.gmra.mrb[2].mxu0 %vm513_vm10, %v494_v8  ;;  %v219_v30 = vpop.permute.xlu0 %218 }
  0xc6   : > { %v309_v10 = vpop.permute.xlu1 %308  ;;  %1245 = vmatprep.mubr.msk.f32.mxu0 %vm513_vm10, %v495_v9  ;;  %vm245_vm9 = vcmp.eq.s32.totalorder %v219_v30, %v1567_v40 }
  0xc7   : > { %vm339_vm1 = vcmp.eq.s32.totalorder %v309_v10, %v1567_v40  ;;  %v1147_v39 = vsel %vm245_vm9, 1.0, %v1418_v43 }
  0xc8   : > { %v1161_v17 = vsel %vm339_vm1, 1.0, %v1418_v43 }
  0xc9   : > { %v387_v21 = vadd.f32 %v1161_v17, %v1145_v18  ;;  %v210_v34 = vpop.permute.xlu0 %209 }
  0xca   : > { %vm242_vm15 = vcmp.eq.s32.totalorder %v210_v34, %v1567_v40 }
  0xcb   : > { %v204_v11 = vpop.permute.xlu1 %203  ;;  %v1144_v54 = vsel %vm242_vm15, 1.0, %v1418_v43 }
  0xcc   : > { %vm240_vm6 = vcmp.eq.s32.totalorder %v204_v11, %v1567_v40 }
  0xcd   : > { %v1142_v26 = vsel %vm240_vm6, 1.0, %v1418_v43  ;;  %v225_v36 = vpop.permute.xlu0 %224 }
  0xd0   : > { %v300_v12 = vpop.permute.xlu1 %299 }
  0xd1   : > { %vm336_vm4 = vcmp.eq.s32.totalorder %v300_v12, %v1567_v40  ;;  %v1639_v46 = vpop.permute.xlu0 %230 }
  0xd2   : > { %v1158_v22 = vsel %vm336_vm4, 1.0, %v1418_v43 }
  0xd3   : > { %v384_v29 = vadd.f32 %v1158_v22, %v1142_v26 }
  0xd4   : > { %v312_v14 = vpop.permute.xlu1 %311 }
  0xd5   : > { %vm340_vm2 = vcmp.eq.s32.totalorder %v312_v14, %v1567_v40 }
  0xd6   : > { %v1162_v16 = vsel %vm340_vm2, 1.0, %v1418_v43  ;;  %v306_v50 = vpop.permute.xlu0 %305 }
  0xd7   : > { %v388_v19 = vadd.f32 %v1162_v16, %v1146_v15  ;;  %vm338_vm0 = vcmp.eq.s32.totalorder %v306_v50, %v1567_v40 }
  0xd8   : > { %v1160_v55 = vsel %vm338_vm0, 1.0, %v1418_v43 }
  0xd9   : > { %v421_v20 = vpop.permute.xlu1 %420  ;;  %v500_v27 = vadd.f32 %v1178_v24, %v388_v19  ;;  %v386_v59 = vadd.f32 %v1160_v55, %v1144_v54 }
  0xda   : > { %vm451_vm7 = vcmp.eq.s32.totalorder %v421_v20, %v1567_v40  ;;  %v324_v5 = vpop.permute.xlu0 %323 }
  0xdb   : > { %v1177_v23 = vsel %vm451_vm7, 1.0, %v1418_v43  ;;  %vm247_vm7 = vcmp.eq.s32.totalorder %v225_v36, %v1567_v40  ;;  %vm344_vm9 = vcmp.eq.s32.totalorder %v324_v5, %v1567_v40 }
  0xdc   : > { %v499_v25 = vadd.f32 %v1177_v23, %v387_v21  ;;  %v1149_v8 = vsel %vm247_vm7, 1.0, %v1418_v43  ;;  %v1166_v11 = vsel %vm344_vm9, 1.0, %v1418_v43  ;;  %vm975_vm7 = vcmask 261312  }
  0xdd   : > { %v412_v28 = vpop.permute.xlu1 %411  ;;  %vm989_vm9 = vcmask 392512  }
  0xde   : > { %vm448_vm8 = vcmp.eq.s32.totalorder %v412_v28, %v1567_v40  ;;  %1251 = vmatprep.mubr.msk.f32.mxu1 %vm513_vm10, %v499_v25  ;;  %v330_v21 = vpop.permute.xlu0 %329 }
  0xdf   : > { %v1174_v31 = vsel %vm448_vm8, 1.0, %v1418_v43  ;;  %1252 = vmatmul.mubr.msk.f32.vlgmr.msra.gmra.mrb[0].mxu1 %vm513_vm10, %v500_v27  ;;  %vm346_vm0 = vcmp.eq.s32.totalorder %v330_v21, %v1567_v40 }
  0xe0   : > { %v496_v32 = vadd.f32 %v1174_v31, %v384_v29  ;;  %v1168_v29 = vsel %vm346_vm0, 1.0, %v1418_v43  ;;  %vm1031_vm0 = vcmask 786112  }
  0xe2   : > { %v207_v33 = vpop.permute.xlu1 %206  ;;  %1246 = vmatmul.mubr.msk.f32.gmra.mrb[4].mxu0 %vm513_vm10, %v496_v32 }
  0xe3   : > { %vm241_vm14 = vcmp.eq.s32.totalorder %v207_v33, %v1567_v40 }
  0xe4   : > { %v1143_v51 = vsel %vm241_vm14, 1.0, %v1418_v43  ;;  %vm249_vm14 = vcmp.eq.s32.totalorder %v1639_v46, %v1567_v40 }
  0xe5   : > { %v1151_v23 = vsel %vm249_vm14, 1.0, %v1418_v43  ;;  %vm1017_vm14 = vcmask 654912  }
  0xe7   : > { %v303_v35 = vpop.permute.xlu1 %302 }
  0xe8   : > { %vm337_vm13 = vcmp.eq.s32.totalorder %v303_v35, %v1567_v40 }
  0xe9   : > { %v1159_v42 = vsel %vm337_vm13, 1.0, %v1418_v43 }
  0xea   : > { %v385_v53 = vadd.f32 %v1159_v42, %v1143_v51 }
  0xeb   : > { %v315_v38 = vpop.permute.xlu1 %314 }
  0xec   : > { %vm341_vm12 = vcmp.eq.s32.totalorder %v315_v38, %v1567_v40 }
  0xed   : > { %v1163_v41 = vsel %vm341_vm12, 1.0, %v1418_v43 }
  0xee   : > { %v389_v44 = vadd.f32 %v1163_v41, %v1147_v39 }
  0xf0   : > { %v501_v47 = vadd.f32 %v1179_v45, %v389_v44  ;;  %v222_v48 = vpop.permute.xlu1 %221 }
  0xf1   : > { %vm246_vm3 = vcmp.eq.s32.totalorder %v222_v48, %v1567_v40 }
  0xf2   : > { %1254 = vmatprep.mubr.msk.f32.mxu1 %vm513_vm10, %v501_v47  ;;  %v1148_v63 = vsel %vm246_vm3, 1.0, %v1418_v43  ;;  %vm757_vm3 = vcmp.eq.s32.totalorder %v1567_v40, 17 }
  0xf5   : > { %v318_v49 = vpop.permute.xlu1 %317 }
  0xf6   : > { %vm342_vm2 = vcmp.eq.s32.totalorder %v318_v49, %v1567_v40 }
  0xf7   : > { %v1164_v60 = vsel %vm342_vm2, 1.0, %v1418_v43 }
  0xf8   : > { %v390_v1 = vadd.f32 %v1164_v60, %v1148_v63 }
  0xfa   : > { %v415_v52 = vpop.permute.xlu1 %414 }
  0xfb   : > { %vm449_vm1 = vcmp.eq.s32.totalorder %v415_v52, %v1567_v40 }
  0xfc   : > { %v1175_v56 = vsel %vm449_vm1, 1.0, %v1418_v43 }
  0xfd   : > { %v497_v57 = vadd.f32 %v1175_v56, %v385_v53 }
  0xfe   : > { %v418_v58 = vpop.permute.xlu1 %417 }
  0xff   : > { %vm450_vm4 = vcmp.eq.s32.totalorder %v418_v58, %v1567_v40  ;;  %1248 = vmatprep.mubr.msk.f32.mxu0 %vm513_vm10, %v497_v57 }
 0x100   : > { %v1176_v61 = vsel %vm450_vm4, 1.0, %v1418_v43  ;;  %vm708_vm4 = vcmp.eq.s32.totalorder %v1567_v40, 16 }
 0x101   : > { %v498_v62 = vadd.f32 %v1176_v61, %v386_v59 }
 0x102   : > { %v430_v0 = vpop.permute.xlu1 %429 }
 0x103   : > { %vm454_vm5 = vcmp.eq.s32.totalorder %v430_v0, %v1567_v40  ;;  %1249 = vmatmul.mubr.msk.f32.gmra.mrb[6].mxu0 %vm513_vm10, %v498_v62 }
 0x104   : > { %v1180_v2 = vsel %vm454_vm5, 1.0, %v1418_v43  ;;  %vm961_vm5 = vcmask 130112  }
 0x105   : > { %v502_v3 = vadd.f32 %v1180_v2, %v390_v1 }
 0x107   : > { %1255 = vmatmul.mubr.msk.f32.gmra.mrb[2].mxu1 %vm513_vm10, %v502_v3  ;;  %v321_v4 = vpop.permute.xlu1 %320 }
 0x108   : > { %vm343_vm6 = vcmp.eq.s32.totalorder %v321_v4, %v1567_v40 }
 0x109   : > { %v1165_v7 = vsel %vm343_vm6, 1.0, %v1418_v43  ;;  %vm968_vm6 = vcmask 195712  }
 0x10a   : > { %v391_v12 = vadd.f32 %v1165_v7, %v1149_v8 }
 0x10c   : > { %v228_v6 = vpop.permute.xlu1 %227 }
 0x10d   : > { %vm248_vm8 = vcmp.eq.s32.totalorder %v228_v6, %v1567_v40 }
 0x10e   : > { %v1150_v9 = vsel %vm248_vm8, 1.0, %v1418_v43  ;;  %vm982_vm8 = vcmask 326912  }
 0x10f   : > { %v392_v15 = vadd.f32 %v1166_v11, %v1150_v9 }
 0x111   : > { %v433_v10 = vpop.permute.xlu1 %432 }
 0x112   : > { %vm455_vm11 = vcmp.eq.s32.totalorder %v433_v10, %v1567_v40 }
 0x113   : > { %v1181_v13 = vsel %vm455_vm11, 1.0, %v1418_v43  ;;  %vm996_vm11 = vcmask 458112  }
 0x114   : > { %v503_v14 = vadd.f32 %v1181_v13, %v391_v12 }
 0x115   : > { %v436_v16 = vpop.permute.xlu1 %435 }
 0x116   : > { %vm456_vm12 = vcmp.eq.s32.totalorder %v436_v16, %v1567_v40  ;;  %1257 = vmatprep.mubr.msk.f32.mxu1 %vm513_vm10, %v503_v14 }
 0x117   : > { %v1182_v17 = vsel %vm456_vm12, 1.0, %v1418_v43  ;;  %vm1003_vm12 = vcmask 523712  }
 0x118   : > { %v504_v18 = vadd.f32 %v1182_v17, %v392_v15 }
 0x11a   : > { %v327_v19 = vpop.permute.xlu1 %326  ;;  %1258 = vmatmul.mubr.msk.f32.gmra.mrb[4].mxu1 %vm513_vm10, %v504_v18 }
 0x11b   : > { %vm345_vm13 = vcmp.eq.s32.totalorder %v327_v19, %v1567_v40 }
 0x11c   : > { %v1167_v22 = vsel %vm345_vm13, 1.0, %v1418_v43  ;;  %vm1010_vm13 = vcmask 589312  }
 0x11d   : > { %v393_v25 = vadd.f32 %v1167_v22, %v1151_v23 }
 0x11f   : > { %v234_v20 = vpop.permute.xlu1 %233 }
 0x120   : > { %vm250_vm15 = vcmp.eq.s32.totalorder %v234_v20, %v1567_v40 }
 0x121   : > { %v1152_v26 = vsel %vm250_vm15, 1.0, %v1418_v43  ;;  %vm1024_vm15 = vcmask 720512  }
 0x122   : > { %v394_v31 = vadd.f32 %v1168_v29, %v1152_v26 }
 0x124   : > { %v439_v24 = vpop.permute.xlu1 %438 }
 0x125   : > { %vm457_vm1 = vcmp.eq.s32.totalorder %v439_v24, %v1567_v40 }
 0x126   : > { %v1183_v27 = vsel %vm457_vm1, 1.0, %v1418_v43  ;;  %vm1038_vm1 = vcmask 851712  }
 0x127   : > { %v505_v28 = vadd.f32 %v1183_v27, %v393_v25 }
 0x128   : > { %v442_v30 = vpop.permute.xlu1 %441 }
 0x129   : > { %vm458_vm2 = vcmp.eq.s32.totalorder %v442_v30, %v1567_v40  ;;  %1260 = vmatprep.mubr.msk.f32.mxu1 %vm513_vm10, %v505_v28 }
 0x12a   : > { %v1184_v32 = vsel %vm458_vm2, 1.0, %v1418_v43  ;;  %vm1045_vm2 = vcmask 917312  }
 0x12b   : > { %v506_v33 = vadd.f32 %v1184_v32, %v394_v31 }
 0x12d   : > { %1261 = vmatmul.mubr.msk.f32.gmra.mrb[6].mxu1 %vm513_vm10, %v506_v33  ;;  %vm806_vm10 = vcmp.lt.s32.totalorder %v1567_v40, 16 }
 0x194   : > { %v1241_v34 = vpop.f32.mrb[0].mxu0 }
 0x195   : > { %v628_v35 = vpop.f32.mrb[1].mxu0  ;;  %v759_v36 = vsel %vm757_vm3, %v1241_v34, 0.0  ;;  %v710_v41 = vsel %vm708_vm4, %v1241_v34, 0.0  ;;  %v808_v53 = vmul.f32 %v1241_v34, %v1241_v34 }
 0x196   : > { %776 = vadd.xlane.f32.xlu0 %v759_v36  ;;  %v758_v49 = vsel %vm757_vm3, %v628_v35, 0.0  ;;  %v709_v50 = vsel %vm708_vm4, %v628_v35, 0.0  ;;  %v807_v56 = vmul.f32 %v628_v35, %v628_v35 }
 0x197   : > { %v824_v55 = vsel %vm806_vm10, %v808_v53, 0.0 }
 0x198   : > { %v1244_v38 = vpop.f32.mrb[2].mxu0  ;;  %v823_v58 = vsel %vm806_vm10, %v807_v56, 0.0 }
 0x199   : > { %v638_v39 = vpop.f32.mrb[3].mxu0  ;;  %v761_v60 = vsel %vm757_vm3, %v1244_v38, 0.0  ;;  %v712_v61 = vsel %vm708_vm4, %v1244_v38, 0.0  ;;  %v810_v9 = vmul.f32 %v1244_v38, %v1244_v38 }
 0x19a   : > { %727 = vadd.xlane.f32.xlu0 %v710_v41  ;;  %v711_v4 = vsel %vm708_vm4, %v638_v39, 0.0  ;;  %v760_v5 = vsel %vm757_vm3, %v638_v39, 0.0  ;;  %v809_v12 = vmul.f32 %v638_v39, %v638_v39 }
 0x19b   : > { %v826_v11 = vsel %vm806_vm10, %v810_v9, 0.0 }
 0x19c   : > { %v825_v14 = vsel %vm806_vm10, %v809_v12, 0.0  ;;  %v1815_v12 = vstv %s707_s20 }
 0x1b2   : > { %v1253_v43 = vpop.f32.mrb[0].mxu1 }
 0x1b3   : > { %v668_v44 = vpop.f32.mrb[1].mxu1  ;;  %v767_v45 = vsel %vm757_vm3, %v1253_v43, 0.0  ;;  %v718_v46 = vsel %vm708_vm4, %v1253_v43, 0.0  ;;  %v816_v52 = vmul.f32 %v1253_v43, %v1253_v43 }
 0x1b4   : > { %792 = vadd.xlane.f32.xlu1 %v767_v45  ;;  %743 = vadd.xlane.f32.xlu0 %v718_v46  ;;  %v766_v42 = vsel %vm757_vm3, %v668_v44, 0.0  ;;  %v717_v51 = vsel %vm708_vm4, %v668_v44, 0.0  ;;  %v815_v57 = vmul.f32 %v668_v44, %v668_v44 }
 0x1b5   : > { %v1702_v47 = vpop.f32.mrb[4].mxu0  ;;  %v832_v54 = vsel %vm806_vm10, %v816_v52, 0.0 }
 0x1b6   : > { %v1704_v48 = vpop.f32.mrb[5].mxu0  ;;  %v831_v59 = vsel %vm806_vm10, %v815_v57, 0.0  ;;  %v714_v13 = vsel %vm708_vm4, %v1702_v47, 0.0  ;;  %v763_v20 = vsel %vm757_vm3, %v1702_v47, 0.0  ;;  %v812_v22 = vmul.f32 %v1702_v47, %v1702_v47 }
 0x1b7   : > { %v762_v18 = vsel %vm757_vm3, %v1704_v48, 0.0  ;;  %v713_v26 = vsel %vm708_vm4, %v1704_v48, 0.0  ;;  %v811_v28 = vmul.f32 %v1704_v48, %v1704_v48 }
 0x1b8   : > { %774 = vadd.xlane.f32.xlu1 %v758_v49  ;;  %725 = vadd.xlane.f32.xlu0 %v709_v50  ;;  %v828_v24 = vsel %vm806_vm10, %v812_v22, 0.0 }
 0x1b9   : > { %v827_v29 = vsel %vm806_vm10, %v811_v28, 0.0 }
 0x1bc   : > { %790 = vadd.xlane.f32.xlu0 %v766_v42  ;;  %741 = vadd.xlane.f32.xlu1 %v717_v51 }
 0x1c0   : > { %857 = vadd.xlane.f32.xlu0 %v832_v54  ;;  %841 = vadd.xlane.f32.xlu1 %v824_v55 }
 0x1c4   : > { %839 = vadd.xlane.f32.xlu0 %v823_v58  ;;  %855 = vadd.xlane.f32.xlu1 %v831_v59 }
 0x1c8   : > { %780 = vadd.xlane.f32.xlu0 %v761_v60 }
 0x1cc   : > { %731 = vadd.xlane.f32.xlu0 %v712_v61 }
 0x1d6   : > { %v1250_v62 = vpop.f32.mrb[6].mxu0 }
 0x1d7   : > { %v1727_v63 = vpop.f32.mrb[7].mxu0  ;;  %v716_v30 = vsel %vm708_vm4, %v1250_v62, 0.0  ;;  %v765_v36 = vsel %vm757_vm3, %v1250_v62, 0.0  ;;  %v814_v39 = vmul.f32 %v1250_v62, %v1250_v62 }
 0x1d8   : > { %v764_v35 = vsel %vm757_vm3, %v1727_v63, 0.0  ;;  %v813_v45 = vmul.f32 %v1727_v63, %v1727_v63  ;;  %v715_v46 = vsel %vm708_vm4, %v1727_v63, 0.0 }
 0x1d9   : > { %v830_v43 = vsel %vm806_vm10, %v814_v39, 0.0 }
 0x1da   : > { %v1256_v0 = vpop.f32.mrb[2].mxu1  ;;  %v829_v48 = vsel %vm806_vm10, %v813_v45, 0.0 }
 0x1db   : > { %v678_v1 = vpop.f32.mrb[3].mxu1  ;;  %v769_v2 = vsel %vm757_vm3, %v1256_v0, 0.0  ;;  %v720_v3 = vsel %vm708_vm4, %v1256_v0, 0.0  ;;  %v818_v8 = vmul.f32 %v1256_v0, %v1256_v0 }
 0x1dc   : > { %796 = vadd.xlane.f32.xlu1 %v769_v2  ;;  %747 = vadd.xlane.f32.xlu0 %v720_v3  ;;  %v768_v6 = vsel %vm757_vm3, %v678_v1, 0.0  ;;  %v719_v7 = vsel %vm708_vm4, %v678_v1, 0.0  ;;  %v817_v15 = vmul.f32 %v678_v1, %v678_v1 }
 0x1dd   : > { %v834_v10 = vsel %vm806_vm10, %v818_v8, 0.0 }
 0x1de   : > { %v833_v19 = vsel %vm806_vm10, %v817_v15, 0.0 }
 0x1e0   : > { %729 = vadd.xlane.f32.xlu1 %v711_v4  ;;  %778 = vadd.xlane.f32.xlu0 %v760_v5  ;;  %v1810_v4 = vshrl.u32 %v185_v37, 7  ;;  %v956_v5 = vadd.s32 4294967288, %v1567_v40 }
 0x1e2   : > { %v959_v15 = vsub.s32 %v956_v5, %v1810_v4  ;;  %v954_v37 = vsub.s32 %v1567_v40, %v1810_v4 }
 0x1e4   : > { %794 = vadd.xlane.f32.xlu0 %v768_v6  ;;  %745 = vadd.xlane.f32.xlu1 %v719_v7 }
 0x1e8   : > { %861 = vadd.xlane.f32.xlu0 %v834_v10  ;;  %845 = vadd.xlane.f32.xlu1 %v826_v11 }
 0x1ec   : > { %735 = vadd.xlane.f32.xlu0 %v714_v13  ;;  %843 = vadd.xlane.f32.xlu1 %v825_v14 }
 0x1ed   : > { %v1259_v16 = vpop.f32.mrb[4].mxu1 }
 0x1ee   : > { %v688_v17 = vpop.f32.mrb[5].mxu1  ;;  %v771_v23 = vsel %vm757_vm3, %v1259_v16, 0.0  ;;  %v820_v25 = vmul.f32 %v1259_v16, %v1259_v16  ;;  %v722_v49 = vsel %vm708_vm4, %v1259_v16, 0.0 }
 0x1ef   : > { %v770_v21 = vsel %vm757_vm3, %v688_v17, 0.0  ;;  %v819_v31 = vmul.f32 %v688_v17, %v688_v17  ;;  %v721_v42 = vsel %vm708_vm4, %v688_v17, 0.0 }
 0x1f0   : > { %782 = vadd.xlane.f32.xlu0 %v762_v18  ;;  %859 = vadd.xlane.f32.xlu1 %v833_v19  ;;  %v836_v27 = vsel %vm806_vm10, %v820_v25, 0.0 }
 0x1f1   : > { %v835_v34 = vsel %vm806_vm10, %v819_v31, 0.0 }
 0x1f4   : > { %784 = vadd.xlane.f32.xlu1 %v763_v20  ;;  %798 = vadd.xlane.f32.xlu0 %v770_v21 }
 0x1f8   : > { %800 = vadd.xlane.f32.xlu1 %v771_v23  ;;  %849 = vadd.xlane.f32.xlu0 %v828_v24 }
 0x1fc   : > { %733 = vadd.xlane.f32.xlu1 %v713_v26  ;;  %865 = vadd.xlane.f32.xlu0 %v836_v27 }
 0x200   : > { %847 = vadd.xlane.f32.xlu1 %v827_v29  ;;  %739 = vadd.xlane.f32.xlu0 %v716_v30  ;;  %v1262_v32 = vpop.f32.mrb[6].mxu1 }
 0x201   : > { %v698_v33 = vpop.f32.mrb[7].mxu1  ;;  %v773_v41 = vsel %vm757_vm3, %v1262_v32, 0.0  ;;  %v822_v44 = vmul.f32 %v1262_v32, %v1262_v32  ;;  %v724_v51 = vsel %vm708_vm4, %v1262_v32, 0.0 }
 0x202   : > { %v772_v38 = vsel %vm757_vm3, %v698_v33, 0.0  ;;  %v821_v50 = vmul.f32 %v698_v33, %v698_v33  ;;  %v723_v53 = vsel %vm708_vm4, %v698_v33, 0.0  ;;  %vm1052_vm3 = vcmask 982912  }
 0x203   : > { %v838_v47 = vsel %vm806_vm10, %v822_v44, 0.0  ;;  %vm1059_vm4 = vcmask 1048512  }
 0x204   : > { %863 = vadd.xlane.f32.xlu1 %v835_v34  ;;  %786 = vadd.xlane.f32.xlu0 %v764_v35  ;;  %v837_v52 = vsel %vm806_vm10, %v821_v50, 0.0 }
 0x208   : > { %788 = vadd.xlane.f32.xlu1 %v765_v36  ;;  %802 = vadd.xlane.f32.xlu0 %v772_v38 }
 0x20c   : > { %804 = vadd.xlane.f32.xlu1 %v773_v41  ;;  %853 = vadd.xlane.f32.xlu0 %v830_v43 }
 0x210   : > { %737 = vadd.xlane.f32.xlu1 %v715_v46  ;;  %869 = vadd.xlane.f32.xlu0 %v838_v47 }
 0x214   : > { %851 = vadd.xlane.f32.xlu1 %v829_v48  ;;  %751 = vadd.xlane.f32.xlu0 %v722_v49 }
 0x218   : > { %749 = vadd.xlane.f32.xlu1 %v721_v42  ;;  %755 = vadd.xlane.f32.xlu0 %v724_v51 }
 0x21c   : > { %867 = vadd.xlane.f32.xlu1 %v837_v52  ;;  %v1853_v52 = vadd.s32 4294967224, %v1567_v40 }
 0x220   : > { %753 = vadd.xlane.f32.xlu1 %v723_v53 }
 0x223   : > { %v777_v54 = vpop.xlane.xlu0 %776 }
 0x227   : > { %v728_v55 = vpop.xlane.xlu0 %727 }
 0x241   : > { %v793_v56 = vpop.xlane.xlu1 %792  ;;  %v744_v57 = vpop.xlane.xlu0 %743 }
 0x245   : > { %v775_v58 = vpop.xlane.xlu1 %774  ;;  %v726_v59 = vpop.xlane.xlu0 %725 }
 0x249   : > { %v742_v60 = vpop.xlane.xlu1 %741  ;;  %v791_v61 = vpop.xlane.xlu0 %790 }
 0x24d   : > { %v842_v62 = vpop.xlane.xlu1 %841  ;;  %v858_v63 = vpop.xlane.xlu0 %857 }
 0x24e   : > { %v872_v0 = vsub.f32 %v842_v62, %v777_v54  ;;  %v880_v1 = vsub.f32 %v858_v63, %v793_v56  ;;  %v1858_v56 = vadd.s32 4294967232, %v1567_v40  ;;  %v1015_v63 = vsub.s32 %v1853_v52, %v1810_v4 }
 0x250   : > { %v888_v2 = vmul.f32 0.5, %v872_v0  ;;  %v896_v3 = vmul.f32 0.5, %v880_v1  ;;  %v1008_v5 = vsub.s32 %v1858_v56, %v1810_v4 }
 0x251   : > { %v856_v6 = vpop.xlane.xlu1 %855  ;;  %v840_v7 = vpop.xlane.xlu0 %839 }
 0x252   : > { %v904_v8 = vadd.f32 %v888_v2, %v728_v55  ;;  %v1813_v9 = vadd.f32 %v896_v3, %v744_v57  ;;  %v879_v10 = vsub.f32 %v856_v6, %v791_v61  ;;  %v871_v11 = vsub.f32 %v840_v7, %v775_v58 }
 0x253   : > { %v1861_v57 = vadd.s32 4294967272, %v1567_v40  ;;  %v1864_v58 = vadd.s32 4294967208, %v1567_v40  ;;  %v1868_v61 = vadd.s32 4294967216, %v1567_v40 }
 0x254   : > { %v895_v13 = vmul.f32 0.5, %v879_v10  ;;  %v887_v14 = vmul.f32 0.5, %v871_v11  ;;  %v921_v16 = vadd.f32 %v1815_v12, %v904_v8  ;;  %v1881_v8 = vadd.s32 4294967256, %v1567_v40 }
 0x255   : > { %v781_v23 = vpop.xlane.xlu0 %780  ;;  %v973_v6 = vsub.s32 %v1861_v57, %v1810_v4  ;;  %v1029_v7 = vsub.s32 %v1864_v58, %v1810_v4  ;;  %v977_v11 = vadd.s32 4294967264, %v1567_v40 }
 0x256   : > { %v1819_v17 = vadd.f32 %v895_v13, %v742_v60  ;;  %v903_v18 = vadd.f32 %v887_v14, %v726_v59  ;;  %v960_v20 = vrot.slane %v921_v16, %v959_v15  ;;  %v963_v59 = vadd.s32 4294967280, %v1567_v40 }
 0x257   : > { %v1022_v15 = vsub.s32 %v1868_v61, %v1810_v4 }
 0x258   : > { %v920_v19 = vadd.f32 %v1815_v12, %v903_v18  ;;  %v966_v10 = vsub.s32 %v963_v59, %v1810_v4 }
 0x259   : > { %v732_v24 = vpop.xlane.xlu0 %731 }
 0x25a   : > { %v955_v21 = vrot.slane %v920_v19, %v954_v37  ;;  %v1889_v37 = vadd.s32 4294967240, %v1567_v40 }
 0x25c   : > { %v1824_v22 = vsel %vm961_vm5, %v960_v20, %v955_v21 }
 0x269   : > { %v1826_v25 = vpop.xlane.xlu1 %796  ;;  %v1828_v26 = vpop.xlane.xlu0 %747 }
 0x26d   : > { %v730_v27 = vpop.xlane.xlu1 %729  ;;  %v779_v28 = vpop.xlane.xlu0 %778 }
 0x271   : > { %v1830_v29 = vpop.xlane.xlu1 %745  ;;  %v1832_v30 = vpop.xlane.xlu0 %794 }
 0x275   : > { %v846_v31 = vpop.xlane.xlu1 %845  ;;  %v1834_v32 = vpop.xlane.xlu0 %861 }
 0x276   : > { %v874_v53 = vsub.f32 %v846_v31, %v781_v23  ;;  %v991_v23 = vadd.s32 4294967248, %v1567_v40  ;;  %v1897_v31 = vadd.s32 4294967192, %v1567_v40 }
 0x278   : > { %v890_v0 = vmul.f32 0.5, %v874_v53 }
 0x279   : > { %v844_v33 = vpop.xlane.xlu1 %843  ;;  %v1836_v34 = vpop.xlane.xlu0 %735 }
 0x27a   : > { %v873_v48 = vsub.f32 %v844_v33, %v779_v28  ;;  %v906_v18 = vadd.f32 %v890_v0, %v732_v24  ;;  %v987_v28 = vsub.s32 %v1881_v8, %v1810_v4  ;;  %v882_v33 = vsub.f32 %v1834_v32, %v1826_v25 }
 0x27b   : > { %v980_v24 = vsub.s32 %v977_v11, %v1810_v4  ;;  %v994_v32 = vsub.s32 %v991_v23, %v1810_v4 }
 0x27c   : > { %v889_v42 = vmul.f32 0.5, %v873_v48  ;;  %v898_v59 = vmul.f32 0.5, %v882_v33 }
 0x27d   : > { %v1838_v35 = vpop.xlane.xlu1 %859  ;;  %v783_v36 = vpop.xlane.xlu0 %782 }
 0x27e   : > { %v905_v60 = vadd.f32 %v889_v42, %v730_v27  ;;  %v881_v27 = vsub.f32 %v1838_v35, %v1832_v30  ;;  %v1001_v30 = vsub.s32 %v1889_v37, %v1810_v4  ;;  %v1909_v35 = vadd.s32 4294967176, %v1567_v40 }
 0x27f   : > { %v914_v11 = vadd.f32 %v898_v59, %v1828_v26 }
 0x280   : > { %v922_v14 = vadd.f32 %v1815_v12, %v905_v60  ;;  %v897_v42 = vmul.f32 0.5, %v881_v27 }
 0x281   : > { %v785_v38 = vpop.xlane.xlu1 %784  ;;  %v1840_v39 = vpop.xlane.xlu0 %798 }
 0x285   : > { %v1842_v41 = vpop.xlane.xlu1 %800  ;;  %v850_v43 = vpop.xlane.xlu0 %849 }
 0x286   : > { %v876_v1 = vsub.f32 %v850_v43, %v785_v38  ;;  %v1903_v38 = vadd.s32 4294967200, %v1567_v40  ;;  %v967_v43 = vrot.slane %v922_v14, %v966_v10 }
 0x288   : > { %v892_v19 = vmul.f32 0.5, %v876_v1 }
 0x289   : > { %v734_v44 = vpop.xlane.xlu1 %733  ;;  %v1844_v45 = vpop.xlane.xlu0 %865 }
 0x28a   : > { %v908_v25 = vadd.f32 %v892_v19, %v1836_v34  ;;  %v884_v60 = vsub.f32 %v1844_v45, %v1842_v41  ;;  %v913_v45 = vadd.f32 %v897_v42, %v1830_v29 }
 0x28c   : > { %v930_v23 = vadd.f32 %v1815_v12, %v913_v45 }
 0x28d   : > { %v848_v46 = vpop.xlane.xlu1 %847  ;;  %v1846_v47 = vpop.xlane.xlu0 %739 }
 0x28e   : > { %v875_v51 = vsub.f32 %v848_v46, %v783_v36  ;;  %v923_v46 = vadd.f32 %v1815_v12, %v906_v18  ;;  %v929_v18 = vadd.f32 %v1815_v12, %v1813_v9  ;;  %v1023_v56 = vrot.slane %v930_v23, %v1022_v15 }
 0x290   : > { %v891_v62 = vmul.f32 0.5, %v875_v51  ;;  %v974_v1 = vrot.slane %v923_v46, %v973_v6  ;;  %v928_v6 = vadd.f32 %v1815_v12, %v1819_v17  ;;  %v1047_v17 = vadd.s32 4294967184, %v1567_v40 }
 0x291   : > { %v1848_v49 = vpop.xlane.xlu1 %863  ;;  %v1850_v50 = vpop.xlane.xlu0 %786  ;;  %v1016_v40 = vrot.slane %v929_v18, %v1015_v63 }
 0x292   : > { %v907_v16 = vadd.f32 %v891_v62, %v734_v44  ;;  %v883_v51 = vsub.f32 %v1848_v49, %v1840_v39  ;;  %v1036_v62 = vsub.s32 %v1903_v38, %v1810_v4  ;;  %v969_v39 = vsel %vm968_vm6, %v967_v43, %v1824_v22 }
 0x293   : > { %v900_v22 = vmul.f32 0.5, %v884_v60  ;;  %v1009_v9 = vrot.slane %v928_v6, %v1008_v5 }
 0x294   : > { %v924_v44 = vadd.f32 %v1815_v12, %v907_v16 }
 0x295   : > { %v789_v54 = vpop.xlane.xlu1 %788  ;;  %v1855_v55 = vpop.xlane.xlu0 %802 }
 0x296   : > { %v981_v49 = vrot.slane %v924_v44, %v980_v24  ;;  %v931_v24 = vadd.f32 %v1815_v12, %v914_v11 }
 0x298   : > { %v1030_v52 = vrot.slane %v931_v24, %v1029_v7 }
 0x299   : > { %v1872_v2 = vpop.xlane.xlu1 %804  ;;  %v854_v3 = vpop.xlane.xlu0 %853 }
 0x29a   : > { %v878_v13 = vsub.f32 %v854_v3, %v789_v54  ;;  %v1043_v54 = vsub.s32 %v1897_v31, %v1810_v4  ;;  %v925_v3 = vadd.f32 %v1815_v12, %v908_v25 }
 0x29c   : > { %v894_v36 = vmul.f32 0.5, %v878_v13  ;;  %v976_v13 = vsel %vm975_vm7, %v974_v1, %v969_v39  ;;  %v988_v19 = vrot.slane %v925_v3, %v987_v28 }
 0x29d   : > { %v738_v20 = vpop.xlane.xlu1 %737  ;;  %v870_v21 = vpop.xlane.xlu0 %869  ;;  %v983_v16 = vsel %vm982_vm8, %v981_v49, %v976_v13 }
 0x29e   : > { %v910_v34 = vadd.f32 %v894_v36, %v1846_v47  ;;  %v886_v8 = vsub.f32 %v870_v21, %v1872_v2  ;;  %v899_v47 = vmul.f32 0.5, %v883_v51  ;;  %v990_v38 = vsel %vm989_vm9, %v988_v19, %v983_v16 }
 0x2a0   : > { %v927_v14 = vadd.f32 %v1815_v12, %v910_v34  ;;  %v902_v26 = vmul.f32 0.5, %v886_v8 }
 0x2a1   : > { %v852_v48 = vpop.xlane.xlu1 %851  ;;  %v752_v57 = vpop.xlane.xlu0 %751 }
 0x2a2   : > { %v877_v53 = vsub.f32 %v852_v48, %v1850_v50  ;;  %v1057_v50 = vsub.s32 %v1909_v35, %v1810_v4  ;;  %v1002_v36 = vrot.slane %v927_v14, %v1001_v30 }
 0x2a4   : > { %v893_v0 = vmul.f32 0.5, %v877_v53 }
 0x2a5   : > { %v750_v41 = vpop.xlane.xlu1 %749  ;;  %v756_v29 = vpop.xlane.xlu0 %755 }
 0x2a6   : > { %v909_v10 = vadd.f32 %v893_v0, %v738_v20  ;;  %v915_v37 = vadd.f32 %v899_v47, %v750_v41  ;;  %v916_v20 = vadd.f32 %v900_v22, %v752_v57  ;;  %v918_v43 = vadd.f32 %v902_v26, %v756_v29 }
 0x2a8   : > { %v926_v2 = vadd.f32 %v1815_v12, %v909_v10  ;;  %v932_v44 = vadd.f32 %v1815_v12, %v915_v37  ;;  %v933_v30 = vadd.f32 %v1815_v12, %v916_v20  ;;  %v935_v42 = vadd.f32 %v1815_v12, %v918_v43 }
 0x2a9   : > { %v868_v21 = vpop.xlane.xlu1 %867 }
 0x2aa   : > { %v995_v27 = vrot.slane %v926_v2, %v994_v32  ;;  %v885_v33 = vsub.f32 %v868_v21, %v1855_v55  ;;  %v1050_v32 = vsub.s32 %v1047_v17, %v1810_v4  ;;  %v1037_v61 = vrot.slane %v932_v44, %v1036_v62 }
 0x2ab   : > { %v1044_v53 = vrot.slane %v933_v30, %v1043_v54 }
 0x2ac   : > { %v997_v28 = vsel %vm996_vm11, %v995_v27, %v990_v38  ;;  %v901_v46 = vmul.f32 0.5, %v885_v33 }
 0x2ad   : > { %v1004_v55 = vsel %vm1003_vm12, %v1002_v36, %v997_v28  ;;  %v754_v25 = vpop.xlane.xlu1 %753 }
 0x2ae   : > { %v1011_v5 = vsel %vm1010_vm13, %v1009_v9, %v1004_v55  ;;  %v917_v48 = vadd.f32 %v901_v46, %v754_v25 }
 0x2af   : > { %v1018_v63 = vsel %vm1017_vm14, %v1016_v40, %v1011_v5 }
 0x2b0   : > { %v1025_v51 = vsel %vm1024_vm15, %v1023_v56, %v1018_v63  ;;  %v934_v15 = vadd.f32 %v1815_v12, %v917_v48  ;;  %v1058_v12 = vrot.slane %v935_v42, %v1057_v50 }
 0x2b1   : > { %v1032_v57 = vsel %vm1031_vm0, %v1030_v52, %v1025_v51 }
 0x2b2   : > { %v1039_v58 = vsel %vm1038_vm1, %v1037_v61, %v1032_v57  ;;  %v1051_v7 = vrot.slane %v934_v15, %v1050_v32 }
 0x2b3   : > { %v1046_v59 = vsel %vm1045_vm2, %v1044_v53, %v1039_v58 }
 0x2b4   : > { %v1053_v60 = vsel %vm1052_vm3, %v1051_v7, %v1046_v59 }
 0x2b5   : > { %v1060_v31 = vsel %vm1059_vm4, %v1058_v12, %v1053_v60 }
 0x2b6   : > { %1062 = vst [vmem:[%s163_s26] sm:$0x1] %v1060_v31 }
 0x2b7   : > { %1364 = shalt.err (!%p1361_p3)
}
 0x2b8   : > { %s1365_s8 = scalar_lea.hbm %s1980_s30, 16  ;;  %s1369_s11 = scalar_lea.hbm %s2027_s3, 32 }
 0x2b9   : > { %p1366_p4 = scmp.ne.s32.totalorder %s1980_s30, %s1365_s8  ;;  %p1370_p9 = scmp.lt.u32.totalorder %s1980_s30, %s2027_s3 }
 0x2ba   : > { %p1371_p10 = scmp.lt.u32.totalorder %s1369_s11, %s1365_s8  ;;  %p1373_p12 = scmp.lt.u32.totalorder %s1365_s8, %s1980_s30 }
 0x2bb   : > { %p1367_p7 = pnand %p1366_p4, %p1481_p5 }
 0x2bc   : > { %p1372_p11 = por %p1371_p10, %p1370_p9 }
 0x2bd   : > { %p1368_p8 = pneg %p1367_p7 }
 0x2be   : > { %p1374_p13 = por %p1373_p12, %p1372_p11 }
 0x2c0   : > { %p1375_p0 = pnand %p1374_p13, %p1368_p8 }
 0x2c2   : > { %1378 = shalt.err (!%p1375_p0)
}
 0x2c3   : > { %1281 = dma.vmem_to_hbm [thread:$0]  (%p1481_p5), %s1982_s27, 16, %s1980_s30, %s1064_s2  }
 0x2c4 PF: > { %p1287_p1 = scmp.ge.s32.totalorder %s1413_s17, 2  ;;  %s1088_s18 = sand.u32 1, %s1401_s14  }
 0x2c5   : > { %s1089_s20 = scalar_lea.sflag [#allocation4], %s1088_s18 }
 0x2c6   : > { %p1284_p2 = pnand %p1287_p1, %p1485_p6 }
 0x2c8   : > { %1396 = dma.done.wait (!%p1284_p2), %s1089_s20, 16  }
 0x2c9   : > { %1398 = vsyncadd (!%p1284_p2), %s1089_s20, 4294967280  ;;  %p14_p3 = scmp.ge.s32.totalorder %s1468_s19, 4   ;;  %s2030_s14 = smov %s1405_s15 }
 0x2ca   : > { %s2031_s15 = smov %s1409_s16  ;;  %s2032_s16 = smov %s1479_s22 }
 0x2cb   : > { %s2033_s17 = smov %s1468_s19  ;;  %16 = sbr.rel (!%p14_p3) target bundleno = 5 (0x5), region = 67 }
 0x2d2   :  { %1093 = vsyncpa [#allocation4], 1 }
 0x2d3   :  { %1095 = vsyncpa [#allocation4 + $0x1], 1 }

</bundles_post_ra>
